<compile_context>
chip_gen: v7x
topology: tpu7x:2x2x1
jax: 0.10.0
libtpu: 0.0.40
codegen_flags: <defaults>
</compile_context>

<pallas_src>
import functools

import jax
import jax.numpy as jnp
from jax.experimental import pallas as pl
from jax.experimental.pallas import tpu as pltpu

_HIGHEST = jax.lax.Precision.HIGHEST


# ----------------------------------------------------------------------------
# One-time probe of pltpu.roll's shift convention (review: "determine the
# convention once and emit only the correct roll per tap").
# ----------------------------------------------------------------------------
@functools.lru_cache(maxsize=None)
def _roll_matches_jnp_roll() -> bool:
    """True iff pltpu.roll(x, k, axis)[i] == x[(i - k) % n]  (jnp.roll semantics)."""

    def probe_kernel(x_ref, o_ref):
        o_ref[...] = pltpu.roll(x_ref[...], 3, axis=1)

    x = jnp.tile(jnp.arange(128, dtype=jnp.float32), (8, 1))
    got = jax.device_get(
        pl.pallas_call(probe_kernel,
                       out_shape=jax.ShapeDtypeStruct((8, 128), jnp.float32))(x))
    if (got == jax.device_get(jnp.roll(x, 3, axis=1))).all():
        return True
    if (got == jax.device_get(jnp.roll(x, -3, axis=1))).all():
        return False
    raise RuntimeError("could not determine pltpu.roll shift convention")


# ----------------------------------------------------------------------------
# Fused kernel: conv1 -> bn1 -> relu -> conv2 -> bn2 -> relu -> (+x)
# ----------------------------------------------------------------------------
def _resnet_block_kernel(hdim, wdim, roll_is_jnp,
                         x_ref, w1_ref, g1_ref, b1_ref,
                         w2_ref, g2_ref, b2_ref, o_ref):
    # x_ref    : (cp, nhw)     activations, channels on sublanes, pixels on lanes
    # w*_ref   : (9, cp, cp)   conv weights, [tap, out_channel, in_channel]
    # g*/b*_ref: (cp, 1)       BN affine params
    # o_ref    : (cp, nhw)
    cp, nhw = x_ref.shape
    eps = 1e-5

    # Per-lane pixel coordinates (lane = n*H*W + y*W + x); shared by both convs.
    lane = jax.lax.broadcasted_iota(jnp.int32, (cp, nhw), 1)
    col = lane % wdim
    row = (lane // wdim) % hdim
    col_ok = {-1: col >= 1, 0: None, 1: col <= wdim - 2}
    row_ok = {-1: row >= 1, 0: None, 1: row <= hdim - 2}

    # For each off-centre tap: one roll amount + one (cheap, precomputed) border mask.
    taps = []  # (tap_index, roll_amount, mask)
    for ry in (-1, 0, 1):
        for rx in (-1, 0, 1):
            s = ry * wdim + rx
            if s == 0:
                continue
            t = (ry + 1) * 3 + (rx + 1)
            masks = [m for m in (row_ok[ry], col_ok[rx]) if m is not None]
            mask = masks[0] if len(masks) == 1 else (masks[0] & masks[1])
            amt = (-s) % nhw if roll_is_jnp else s % nhw   # out[i] = act[i + s]
            taps.append((t, amt, mask))

    def conv3x3(act, w_ref_):
        # Centre tap straight from `act`; 8 masked-rolled taps accumulated, no slab.
        y = jnp.dot(w_ref_[4], act, precision=_HIGHEST,
                    preferred_element_type=jnp.float32)
        for t, amt, mask in taps:
            tap = jnp.where(mask, pltpu.roll(act, amt, axis=1), 0.0)
            y = y + jnp.dot(w_ref_[t], tap, precision=_HIGHEST,
                            preferred_element_type=jnp.float32)
        return y

    def bn_relu(y, gamma_ref, beta_ref):
        # PyTorch training-mode BatchNorm2d (biased stats over N,H,W) folded into a
        # per-channel affine, applied as a single FMA + max.  Stats in one pass
        # (sum & sum-of-squares) -- fine for these magnitudes (see review note).
        inv_n = 1.0 / nhw
        mean = jnp.sum(y, axis=1, keepdims=True) * inv_n
        mean_sq = jnp.sum(y * y, axis=1, keepdims=True) * inv_n
        var = jnp.maximum(mean_sq - mean * mean, 0.0)
        scale = gamma_ref[...] * jax.lax.rsqrt(var + eps)   # (cp, 1)
        bias = beta_ref[...] - mean * scale                 # (cp, 1)
        return jnp.maximum(y * scale + bias, 0.0)

    x = x_ref[...]
    h1 = bn_relu(conv3x3(x, w1_ref), g1_ref, b1_ref)
    h2 = bn_relu(conv3x3(h1, w2_ref), g2_ref, b2_ref)
    o_ref[...] = h2 + x            # residual: relu(bn(conv2(.))) + x


# ----------------------------------------------------------------------------
# Parameter / layout preparation (done once per model, not per call)
# ----------------------------------------------------------------------------
def _round_up(x, m):
    return (x + m - 1) // m * m


def _prep_conv_weight(w_hwio, cp):
    # (3,3,ci,co) HWIO -> (9, cp, cp) as [tap, out_channel, in_channel], zero-padded.
    kh, kw, ci, co = w_hwio.shape
    w = jnp.transpose(w_hwio, (0, 1, 3, 2)).reshape(kh * kw, co, ci)
    w = jnp.pad(w, ((0, 0), (0, cp - co), (0, cp - ci)))
    return w.astype(jnp.float32)


def _prep_channel_vec(v, cp):
    return jnp.pad(v.astype(jnp.float32), (0, cp - v.shape[0])).reshape(cp, 1)


def prepare_params(params, cp):
    (w1, g1, b1), (w2, g2, b2) = params
    return (_prep_conv_weight(w1, cp), _prep_channel_vec(g1, cp), _prep_channel_vec(b1, cp),
            _prep_conv_weight(w2, cp), _prep_channel_vec(g2, cp), _prep_channel_vec(b2, cp))


def _nchw_to_cm(x_nchw, cp):
    n, c, h, w = x_nchw.shape
    x_cm = jnp.transpose(x_nchw, (1, 0, 2, 3)).reshape(c, n * h * w)
    return jnp.pad(x_cm, ((0, cp - c), (0, 0))).astype(jnp.float32)


def _cm_to_nchw(x_cm, n, c, h, w):
    return jnp.transpose(x_cm[:c].reshape(c, n, h, w), (1, 0, 2, 3))


def _block_call(x_cm, prepped, hdim, wdim, roll_is_jnp):
    cp, nhw = x_cm.shape
    return pl.pallas_call(
        functools.partial(_resnet_block_kernel, hdim, wdim, roll_is_jnp),
        out_shape=jax.ShapeDtypeStruct((cp, nhw), jnp.float32),
    )(x_cm, *prepped)


# ----------------------------------------------------------------------------
# Public entry points
# ----------------------------------------------------------------------------
@functools.partial(jax.jit, static_argnames=("hdim", "wdim", "roll_is_jnp"))
def _resnet_layer_cm_jit(x_cm, prepped, *, hdim, wdim, roll_is_jnp):
    return _block_call(x_cm, prepped, hdim, wdim, roll_is_jnp)


def resnet_layer_cm(x_cm, prepped, *, hdim, wdim):
    """Lane-dense entry point: x_cm is (cp, N*H*W); chain many blocks without re-layout."""
    return _resnet_layer_cm_jit(x_cm, prepped, hdim=hdim, wdim=wdim,
                                roll_is_jnp=_roll_matches_jnp_roll())


@functools.partial(jax.jit, static_argnames=("roll_is_jnp",))
def _resnet_layer_nchw_jit(x_nchw, params, *, roll_is_jnp):
    (w1, _, _), _ = params
    n, c, hdim, wdim = x_nchw.shape
    cp = _round_up(max(c, w1.shape[-1]), 8)
    x_cm = _nchw_to_cm(x_nchw, cp)
    prepped = prepare_params(params, cp)
    out_cm = _block_call(x_cm, prepped, hdim, wdim, roll_is_jnp)
    return _cm_to_nchw(out_cm, n, c, hdim, wdim)


def resnet_layer(x_nchw, params):
    """NCHW convenience wrapper (layout glue done once, fused in a single jit)."""
    return _resnet_layer_nchw_jit(x_nchw, params, roll_is_jnp=_roll_matches_jnp_roll())


# ----------------------------------------------------------------------------
# Pure-JAX reference (HIGHEST-precision convs to match the kernel)
# ----------------------------------------------------------------------------
def _ref_cnn_layer(x_nchw, w_hwio, gamma, beta):
    y = jax.lax.conv_general_dilated(
        x_nchw, w_hwio, window_strides=(1, 1), padding="SAME",
        dimension_numbers=("NCHW", "HWIO", "NCHW"), precision=_HIGHEST)
    mean = jnp.mean(y, axis=(0, 2, 3), keepdims=True)
    var = jnp.mean(jnp.square(y - mean), axis=(0, 2, 3), keepdims=True)
    y = (y - mean) * jax.lax.rsqrt(var + 1e-5)
    y = y * gamma.reshape(1, -1, 1, 1) + beta.reshape(1, -1, 1, 1)
    return jnp.maximum(y, 0.0)


def _ref_resnet_layer(x, params):
    (w1, g1, b1), (w2, g2, b2) = params
    return _ref_cnn_layer(_ref_cnn_layer(x, w1, g1, b1), w2, g2, b2) + x


# ----------------------------------------------------------------------------
if __name__ == "__main__":
    inout_c = 7     # matches `in_channel = 7` in the reference script
    mid_c = 8
    N, H, W = 2, 16, 16

    key = jax.random.PRNGKey(0)
    k_x, k_w1, k_w2, k_g1, k_b1, k_g2, k_b2 = jax.random.split(key, 7)

    # NCHW input, as the PyTorch module receives it.
    x = jax.random.normal(k_x, (N, inout_c, H, W), jnp.float32)

    # Conv weights in HWIO; non-trivial BN affine to exercise the folded scale/bias path.
    w1 = jax.random.normal(k_w1, (3, 3, inout_c, mid_c), jnp.float32) * 0.1
    w2 = jax.random.normal(k_w2, (3, 3, mid_c, inout_c), jnp.float32) * 0.1
    g1 = 1.0 + 0.1 * jax.random.normal(k_g1, (mid_c,), jnp.float32)
    b1 = 0.1 * jax.random.normal(k_b1, (mid_c,), jnp.float32)
    g2 = 1.0 + 0.1 * jax.random.normal(k_g2, (inout_c,), jnp.float32)
    b2 = 0.1 * jax.random.normal(k_b2, (inout_c,), jnp.float32)
    params = ((w1, g1, b1), (w2, g2, b2))

    out = jax.block_until_ready(resnet_layer(x, params))
    assert out.shape == x.shape

    ref = _ref_resnet_layer(x, params)
    err = float(jnp.max(jnp.abs(out - ref)))
    assert jnp.allclose(out, ref, rtol=2e-4, atol=2e-4), \
        f"mismatch vs reference: max abs err {err}"

    # Lane-dense chaining API (what a multi-block network would use): consistency check.
    cp = _round_up(max(inout_c, mid_c), 8)
    x_cm = _nchw_to_cm(x, cp)
    prepped = prepare_params(params, cp)
    out_cm = jax.block_until_ready(resnet_layer_cm(x_cm, prepped, hdim=H, wdim=W))
    out2 = _cm_to_nchw(out_cm, N, inout_c, H, W)
    assert jnp.allclose(out, out2, rtol=1e-6, atol=1e-6)

    print("KERNEL_OK")
</pallas_src>

<mosaic_0001>
module attributes {stable_mosaic.version = 11 : i64} {
  func.func @probe_kernel(%arg0: memref<8x128xf32, #tpu.memory_space<vmem>>, %arg1: memref<8x128xf32, #tpu.memory_space<vmem>>) attributes {dimension_semantics = [], scalar_prefetch = 0 : i64, scratch_operands = 0 : i64, tpu.core_type = #tpu.core_type<tc>} {
    %c0 = arith.constant 0 : index
    %c0_0 = arith.constant 0 : index
    %0 = vector.load %arg0[%c0, %c0_0] : memref<8x128xf32, #tpu.memory_space<vmem>>, vector<8x128xf32>
    %c3_i32 = arith.constant 3 : i32
    %1 = tpu.dynamic_rotate %0 by %c3_i32 dim 1 : vector<8x128xf32>, i32 -> vector<8x128xf32>
    %c0_1 = arith.constant 0 : index
    %c0_2 = arith.constant 0 : index
    %2 = vector.load %arg1[%c0_1, %c0_2] : memref<8x128xf32, #tpu.memory_space<vmem>>, vector<8x128xf32>
    tpu.vector_store %arg1[%c0_1, %c0_2], %1 {strides = array<i32>} : memref<8x128xf32, #tpu.memory_space<vmem>>, vector<8x128xf32>,
    return
  }
}

</mosaic_0001>

<bundles_post_ra>
// kernel: tpu_custom_call.1
= control target key start
LH: loop header
LB: loop body
LE: loop exit
PB: predicated region body
PF: predicated region fallthrough
CT: control target
= control target key end

     0   :  { %6 = vsyncpa [#allocation3], 0  ;;  %s128_s0 = inlined_call_operand.hbm [shape: f32[8,128], index: 0, kind: input, shape index: {}]   ;;  %s129_s1 = inlined_call_operand.hbm [shape: f32[8,128], index: 1, kind: output, shape index: {}]  }
   0x1   :  { %7 = vsyncpa [#allocation4], 0  ;;  %s91_s6 = smov [#allocation2]   ;;  %s43_s10 = scalar_lea.hbm %s128_s0, 128 }
   0x2   :  { %s14_s7 = sshll.u32 %s91_s6, 4  ;;  %p44_p0 = scmp.ne.s32.totalorder %s128_s0, %s43_s10  ;;  %s15_s7 = int_to_ptr.vmem [resolvable:$true] %s14_s7 }
   0x3   :  { %p47_p1 = scmp.lt.u32.totalorder %s43_s10, %s128_s0 }
   0x5   :  { %p49_p2 = pnand %p47_p1, %p44_p0 }
   0x7   :  { %52 = shalt.err (!%p49_p2)
}
   0x8   :  { %s53_s15 = scalar_lea.vmem %s15_s7, 128  ;;  %p58_p4 = scmp.lt.s32.totalorder %s15_s7, %s15_s7 }
   0x9   :  { %p54_p3 = scmp.ne.s32.totalorder %s15_s7, %s53_s15  ;;  %p59_p5 = scmp.lt.s32.totalorder %s53_s15, %s53_s15 }
   0xb   :  { %p60_p6 = por %p59_p5, %p58_p4 }
   0xd   :  { %p61_p7 = pnand %p60_p6, %p54_p3 }
   0xf   :  { %64 = shalt.err (!%p61_p7)
}
  0x10   :  { %17 = dma.hbm_to_vmem [thread:$0]  %s128_s0, 128, %s15_s7, [#allocation3]  }
  0x11   :  { %87 = dma.done.wait [#allocation3], 128  }
  0x12   :  { %88 = vsyncadd [#allocation3], 4294967168  ;;  %v21_v0 = vld [vmem:[#allocation2] sm:$0xff]  ;;  %s92_s18 = smov 3   ;;  %s93_s19 = smov [#allocation5]  }
  0x13   :  { %22 = vrot.lane.b32.xlu0 %v21_v0, %s92_s18  ;;  %s31_s20 = sshll.u32 %s93_s19, 4  ;;  %s32_s20 = int_to_ptr.vmem [resolvable:$true] %s31_s20 }
  0x14   :  { %s65_s21 = scalar_lea.vmem %s32_s20, 128  ;;  %p70_p9 = scmp.lt.s32.totalorder %s32_s20, %s32_s20 }
  0x15   :  { %p66_p8 = scmp.ne.s32.totalorder %s32_s20, %s65_s21  ;;  %p71_p10 = scmp.lt.s32.totalorder %s65_s21, %s65_s21 }
  0x17   :  { %p72_p11 = por %p71_p10, %p70_p9 }
  0x19   :  { %p73_p12 = pnand %p72_p11, %p66_p8 }
  0x85   :  { %v23_v1 = vpop.permute.xlu0 %22 }
  0x86   :  { %24 = vst [vmem:[#allocation5] sm:$0xff] %v23_v1 }
  0x87   :  { %76 = shalt.err (!%p73_p12)
}
  0x88   :  { %s77_s0 = scalar_lea.hbm %s129_s1, 128 }
  0x89   :  { %p78_p13 = scmp.ne.s32.totalorder %s129_s1, %s77_s0  ;;  %p81_p0 = scmp.lt.u32.totalorder %s77_s0, %s129_s1 }
  0x8b   :  { %p83_p1 = pnand %p81_p0, %p78_p13 }
  0x8d   :  { %86 = shalt.err (!%p83_p1)
}
  0x8e   :  { %34 = dma.vmem_to_hbm [thread:$0]  %s32_s20, 128, %s129_s1, [#allocation4]  }
  0x8f   :  { %89 = dma.done.wait [#allocation4], 128  }
  0x90   :  { %90 = vsyncadd [#allocation4], 4294967168 }
  0x91   :  { %38 = vsyncpa [#allocation3], 1 }
  0x92   :  { %39 = vsyncpa [#allocation4], 1 }

</bundles_post_ra>
